<compile_context>
chip_gen: v5e
topology: v5e:2x2
jax: 0.10.0
libtpu: 0.0.40
codegen_flags: <defaults>
</compile_context>

<pallas_src>
import functools

import jax
import jax.numpy as jnp
from jax.experimental import pallas as pl
from jax.experimental.pallas import tpu as pltpu


def _cdiv(a, b):
    return (a + b - 1) // b


def _round_up(a, m):
    return _cdiv(a, m) * m


def _vae_encoder_kernel(hidden_pad, latent, head_pad, out_pad, x_ref, *refs):
    """Fused VAE encoder forward for one batch tile.

    refs = (W_hidden_0, ..., W_hidden_{n-1}, W_head, b_packed, eps, out)
    All hidden widths / head width are pre-padded to 128-lane multiples.
    """
    n_hidden = len(hidden_pad)
    w_refs = refs[:n_hidden]
    w_head_ref = refs[n_hidden]
    b_ref = refs[n_hidden + 1]
    eps_ref = refs[n_hidden + 2]
    out_ref = refs[n_hidden + 3]

    tb = x_ref.shape[0]

    # Encoder stack: bf16 @ bf16 -> f32 accumulate (MXU), + full-row bias, ReLU.
    h = x_ref[...]                                             # bf16 [tb, in]
    for i, wp in enumerate(hidden_pad):
        b = b_ref[pl.ds(i, 1), pl.ds(0, wp)]                   # f32 [1, wp], wp % 128 == 0
        acc = jnp.dot(h, w_refs[i][...], preferred_element_type=jnp.float32) + b
        h = jnp.maximum(acc, 0.0).astype(jnp.bfloat16)         # keep MXU operands bf16

    # Fused gaussian head: one matmul produces [mu | logvar | zero-pad].
    b_head = b_ref[pl.ds(n_hidden, 1), pl.ds(0, head_pad)]
    head = jnp.dot(h, w_head_ref[...], preferred_element_type=jnp.float32) + b_head
    mu = head[:, :latent]
    logvar = head[:, latent:2 * latent]

    # Reparameterize: z = mu + eps * exp(0.5 * logvar)   (exp runs on the EUP slot)
    z = mu + eps_ref[...] * jnp.exp(0.5 * logvar)

    if latent % 128 == 0:
        # Large latent: two 128-lane-aligned, unmasked full-width slice stores.
        out_ref[:, 0:latent] = z
        out_ref[:, latent:3 * latent] = head[:, :2 * latent]
    else:
        # Small latent: single lane-dense slab [z | mu|logvar | zero pad], one store.
        pieces = [z, head[:, :2 * latent]]
        pad = out_pad - 3 * latent
        if pad > 0:
            pieces.append(jnp.zeros((tb, pad), jnp.float32))
        out_ref[...] = jnp.concatenate(pieces, axis=-1)


def vae_encoder_forward(x, params, eps):
    """params = {'layers': [(W[in,out], b[out]), ...], 'mu': (W, b), 'logvar': (W, b)}."""
    batch, data_size = x.shape
    hidden_sizes = tuple(int(W.shape[1]) for W, _ in params["layers"])
    latent = int(params["mu"][0].shape[1])
    n_hidden = len(hidden_sizes)

    hidden_pad = tuple(_round_up(h, 128) for h in hidden_sizes)
    head_pad = _round_up(2 * latent, 128)
    out_pad = 3 * latent if latent % 128 == 0 else max(128, _round_up(3 * latent, 128))

    # ---- one-time operand packing: pad feature widths to 128 lanes (zeros are free) ----
    w_hidden = []
    in_sizes = (data_size,) + hidden_pad[:-1] if n_hidden else ()
    for i, (W, _) in enumerate(params["layers"]):
        in_sz, out_sz = W.shape
        Wp = jnp.zeros((in_sizes[i], hidden_pad[i]), jnp.bfloat16)
        Wp = Wp.at[:in_sz, :out_sz].set(W.astype(jnp.bfloat16))
        w_hidden.append(Wp)

    head_in = hidden_pad[-1] if n_hidden else data_size
    Wmu, bmu = params["mu"]
    Wlv, blv = params["logvar"]
    w_head = jnp.zeros((head_in, head_pad), jnp.bfloat16)
    w_head = w_head.at[:Wmu.shape[0], :latent].set(Wmu.astype(jnp.bfloat16))
    w_head = w_head.at[:Wlv.shape[0], latent:2 * latent].set(Wlv.astype(jnp.bfloat16))

    max_w = max(hidden_pad + (head_pad,))
    b_packed = jnp.zeros((n_hidden + 1, max_w), jnp.float32)
    for i, (_, b) in enumerate(params["layers"]):
        b_packed = b_packed.at[i, : b.shape[0]].set(b.astype(jnp.float32))
    b_packed = b_packed.at[n_hidden, :latent].set(bmu.astype(jnp.float32))
    b_packed = b_packed.at[n_hidden, latent:2 * latent].set(blv.astype(jnp.float32))

    # ---- VMEM-driven batch-tile selection (v7x-safe: 64 MiB physical, <=48 MiB budget) ----
    resident_bytes = (
        sum(int(W.size) * 2 for W in w_hidden)     # bf16 resident weights (single-buffered)
        + int(w_head.size) * 2
        + int(b_packed.size) * 4
    )
    per_row_stream = 2 * (data_size * 2 + latent * 4 + out_pad * 4)   # double-buffered blocks
    per_row_live = 10 * max_w                                          # f32 acc / bf16 act headroom
    per_row = per_row_stream + per_row_live
    budget = 48 << 20

    tb = 128
    for cand in (1024, 512, 256, 128):
        if resident_bytes + cand * per_row <= budget:
            tb = cand
            break

    batch16 = _round_up(batch, 16)                 # bf16 sublane granule
    if batch16 <= 128:
        tb = batch16                               # single small tile, minimal padding
    else:
        # Keep >=2 grid steps (v7x megacore) and bounded pad waste.
        while tb > 128:
            g = _cdiv(batch16, tb)
            if g >= 2 and g * tb - batch16 <= tb // 2:
                break
            tb //= 2

    padded_batch = _round_up(batch16, tb)
    grid = (padded_batch // tb,)

    vmem_need = resident_bytes + tb * per_row
    vmem_limit = int(min(max(2 * vmem_need, 32 << 20), 48 << 20))

    # ---- minimal wrapper-side padding (skipped when already aligned; cast fused in) ----
    x_bf = x.astype(jnp.bfloat16)
    eps_f = eps.astype(jnp.float32)
    if padded_batch != batch:
        pad_rows = padded_batch - batch
        x_bf = jnp.pad(x_bf, ((0, pad_rows), (0, 0)))
        eps_f = jnp.pad(eps_f, ((0, pad_rows), (0, 0)))

    inputs = [x_bf] + w_hidden + [w_head, b_packed, eps_f]
    kernel = functools.partial(_vae_encoder_kernel, hidden_pad, latent, head_pad, out_pad)

    def _build(single_buffer_residents):
        res_kwargs = {}
        if single_buffer_residents:
            # Resident operands (constant index_map) don't need double-buffering.
            res_kwargs = dict(pipeline_mode=pl.Buffered(1))
        in_specs = [pl.BlockSpec((tb, data_size), lambda i: (i, 0))]
        for W in w_hidden:
            in_specs.append(pl.BlockSpec(W.shape, lambda i: (0, 0), **res_kwargs))
        in_specs.append(pl.BlockSpec(w_head.shape, lambda i: (0, 0), **res_kwargs))
        in_specs.append(pl.BlockSpec(b_packed.shape, lambda i: (0, 0), **res_kwargs))
        in_specs.append(pl.BlockSpec((tb, latent), lambda i: (i, 0)))
        out_specs = pl.BlockSpec((tb, out_pad), lambda i: (i, 0))
        return pl.pallas_call(
            kernel,
            out_shape=jax.ShapeDtypeStruct((padded_batch, out_pad), jnp.float32),
            grid=grid,
            in_specs=in_specs,
            out_specs=out_specs,
            compiler_params=pltpu.CompilerParams(
                dimension_semantics=("parallel",),     # shard batch tiles across TCs
                vmem_limit_bytes=vmem_limit,
            ),
        )

    try:
        out = _build(True)(*inputs)
    except Exception:
        # Fallback if this Pallas build rejects Buffered(1): default double-buffering.
        out = _build(False)(*inputs)

    z = out[:batch, :latent]
    mu = out[:batch, latent:2 * latent]
    logvar = out[:batch, 2 * latent:3 * latent]
    return z, mu, logvar


def init_params(key, data_size, hidden_sizes, latent_size):
    """Deterministic parameter init (PyTorch-Linear-style uniform fan-in bound)."""
    sizes = [data_size] + list(hidden_sizes)
    params = {"layers": []}
    for in_sz, out_sz in zip(sizes[:-1], sizes[1:]):
        key, kw, kb = jax.random.split(key, 3)
        bound = 1.0 / jnp.sqrt(in_sz)
        W = jax.random.uniform(kw, (in_sz, out_sz), jnp.float32, -bound, bound)
        b = jax.random.uniform(kb, (out_sz,), jnp.float32, -bound, bound)
        params["layers"].append((W, b))
    for name in ("mu", "logvar"):
        key, kw, kb = jax.random.split(key, 3)
        in_sz = sizes[-1]
        bound = 1.0 / jnp.sqrt(in_sz)
        W = jax.random.uniform(kw, (in_sz, latent_size), jnp.float32, -bound, bound)
        b = jax.random.uniform(kb, (latent_size,), jnp.float32, -bound, bound)
        params[name] = (W, b)
    return params


def reference_forward(x, params, eps):
    """Pure-JAX reference with the same bf16 operand quantization as the kernel."""
    h = x.astype(jnp.bfloat16).astype(jnp.float32)
    for W, b in params["layers"]:
        Wb = W.astype(jnp.bfloat16).astype(jnp.float32)
        h = jnp.maximum(h @ Wb + b, 0.0)
        h = h.astype(jnp.bfloat16).astype(jnp.float32)
    Wmu = params["mu"][0].astype(jnp.bfloat16).astype(jnp.float32)
    Wlv = params["logvar"][0].astype(jnp.bfloat16).astype(jnp.float32)
    mu = h @ Wmu + params["mu"][1]
    logvar = h @ Wlv + params["logvar"][1]
    z = mu + eps * jnp.exp(0.5 * logvar)
    return z, mu, logvar


if __name__ == "__main__":
    # Small shapes consistent with the module: x is [batch, data_size].
    batch = 8
    data_size = 64
    hidden_sizes = [32, 32]
    latent_size = 16

    key = jax.random.PRNGKey(0)
    key, kx, keps, kp = jax.random.split(key, 4)

    x = jax.random.normal(kx, (batch, data_size), jnp.float32)
    eps = jax.random.normal(keps, (batch, latent_size), jnp.float32)
    params = init_params(kp, data_size, hidden_sizes, latent_size)

    z, mu, logvar = vae_encoder_forward(x, params, eps)
    jax.block_until_ready((z, mu, logvar))

    z_ref, mu_ref, lv_ref = reference_forward(x, params, eps)
    assert jnp.allclose(z, z_ref, atol=1e-3, rtol=1e-3)
    assert jnp.allclose(mu, mu_ref, atol=1e-3, rtol=1e-3)
    assert jnp.allclose(logvar, lv_ref, atol=1e-3, rtol=1e-3)

    print("KERNEL_OK")
</pallas_src>

<mosaic_0001>
module attributes {stable_mosaic.version = 11 : i64} {
  func.func @_vae_encoder_kernel(%arg0: i32, %arg1: memref<16x64xbf16, #tpu.memory_space<vmem>>, %arg2: memref<64x128xbf16, #tpu.memory_space<vmem>>, %arg3: memref<128x128xbf16, #tpu.memory_space<vmem>>, %arg4: memref<128x128xbf16, #tpu.memory_space<vmem>>, %arg5: memref<3x128xf32, #tpu.memory_space<vmem>>, %arg6: memref<16x16xf32, #tpu.memory_space<vmem>>, %arg7: memref<16x128xf32, #tpu.memory_space<vmem>>) attributes {dimension_semantics = [#tpu.dimension_semantics<parallel>], iteration_bounds = array<i64: 1>, scalar_prefetch = 0 : i64, scratch_operands = 0 : i64, tpu.core_type = #tpu.core_type<tc>, window_params = [{transform_indices = @transform_0, window_bounds = array<i64: 16, 64>}, {pipeline_mode = #tpu.pipeline_mode<synchronous>, transform_indices = @transform_1, window_bounds = array<i64: 64, 128>}, {pipeline_mode = #tpu.pipeline_mode<synchronous>, transform_indices = @transform_2, window_bounds = array<i64: 128, 128>}, {pipeline_mode = #tpu.pipeline_mode<synchronous>, transform_indices = @transform_3, window_bounds = array<i64: 128, 128>}, {pipeline_mode = #tpu.pipeline_mode<synchronous>, transform_indices = @transform_4, window_bounds = array<i64: 3, 128>}, {transform_indices = @transform_5, window_bounds = array<i64: 16, 16>}, {transform_indices = @transform_6, window_bounds = array<i64: 16, 128>}]} {
    %c0 = arith.constant 0 : index
    %c0_0 = arith.constant 0 : index
    %0 = vector.load %arg1[%c0, %c0_0] : memref<16x64xbf16, #tpu.memory_space<vmem>>, vector<16x64xbf16>
    %c0_1 = arith.constant 0 : index
    %c0_2 = arith.constant 0 : index
    %1 = vector.load %arg5[%c0_1, %c0_2] : memref<3x128xf32, #tpu.memory_space<vmem>>, vector<1x128xf32>
    %c0_3 = arith.constant 0 : index
    %c0_4 = arith.constant 0 : index
    %2 = vector.load %arg2[%c0_3, %c0_4] : memref<64x128xbf16, #tpu.memory_space<vmem>>, vector<64x128xbf16>
    %cst = arith.constant dense<0.000000e+00> : vector<16x128xf32>
    %3 = tpu.matmul %0, %2, %cst {dimension_numbers = #tpu.dot_dimension_numbers<[1], [0], [0], [1], [0, 0, 1, 1], [], []>} : vector<16x64xbf16>, vector<64x128xbf16>, vector<16x128xf32> -> vector<16x128xf32>
    %4 = vector.broadcast %1 : vector<1x128xf32> to vector<16x128xf32>
    %5 = arith.addf %3, %4 : vector<16x128xf32>
    %cst_5 = arith.constant 0.000000e+00 : f32
    %6 = vector.broadcast %cst_5 : f32 to vector<16x128xf32>
    %7 = arith.maximumf %5, %6 : vector<16x128xf32>
    %8 = arith.truncf %7 : vector<16x128xf32> to vector<16x128xbf16>
    %c1 = arith.constant 1 : index
    %c0_6 = arith.constant 0 : index
    %9 = vector.load %arg5[%c1, %c0_6] : memref<3x128xf32, #tpu.memory_space<vmem>>, vector<1x128xf32>
    %c0_7 = arith.constant 0 : index
    %c0_8 = arith.constant 0 : index
    %10 = vector.load %arg3[%c0_7, %c0_8] : memref<128x128xbf16, #tpu.memory_space<vmem>>, vector<128x128xbf16>
    %cst_9 = arith.constant dense<0.000000e+00> : vector<16x128xf32>
    %11 = tpu.matmul %8, %10, %cst_9 {dimension_numbers = #tpu.dot_dimension_numbers<[1], [0], [0], [1], [0, 0, 1, 1], [], []>} : vector<16x128xbf16>, vector<128x128xbf16>, vector<16x128xf32> -> vector<16x128xf32>
    %12 = vector.broadcast %9 : vector<1x128xf32> to vector<16x128xf32>
    %13 = arith.addf %11, %12 : vector<16x128xf32>
    %cst_10 = arith.constant 0.000000e+00 : f32
    %14 = vector.broadcast %cst_10 : f32 to vector<16x128xf32>
    %15 = arith.maximumf %13, %14 : vector<16x128xf32>
    %16 = arith.truncf %15 : vector<16x128xf32> to vector<16x128xbf16>
    %c2 = arith.constant 2 : index
    %c0_11 = arith.constant 0 : index
    %17 = vector.load %arg5[%c2, %c0_11] : memref<3x128xf32, #tpu.memory_space<vmem>>, vector<1x128xf32>
    %c0_12 = arith.constant 0 : index
    %c0_13 = arith.constant 0 : index
    %18 = vector.load %arg4[%c0_12, %c0_13] : memref<128x128xbf16, #tpu.memory_space<vmem>>, vector<128x128xbf16>
    %cst_14 = arith.constant dense<0.000000e+00> : vector<16x128xf32>
    %19 = tpu.matmul %16, %18, %cst_14 {dimension_numbers = #tpu.dot_dimension_numbers<[1], [0], [0], [1], [0, 0, 1, 1], [], []>} : vector<16x128xbf16>, vector<128x128xbf16>, vector<16x128xf32> -> vector<16x128xf32>
    %20 = vector.broadcast %17 : vector<1x128xf32> to vector<16x128xf32>
    %21 = arith.addf %19, %20 : vector<16x128xf32>
    %22 = vector.extract_strided_slice %21 {offsets = [0, 0], sizes = [16, 16], strides = [1, 1]} : vector<16x128xf32> to vector<16x16xf32>
    %23 = vector.extract_strided_slice %21 {offsets = [0, 16], sizes = [16, 16], strides = [1, 1]} : vector<16x128xf32> to vector<16x16xf32>
    %c0_15 = arith.constant 0 : index
    %c0_16 = arith.constant 0 : index
    %24 = vector.load %arg6[%c0_15, %c0_16] : memref<16x16xf32, #tpu.memory_space<vmem>>, vector<16x16xf32>
    %cst_17 = arith.constant 5.000000e-01 : f32
    %25 = vector.broadcast %cst_17 : f32 to vector<16x16xf32>
    %26 = arith.mulf %25, %23 : vector<16x16xf32>
    %27 = math.exp %26 : vector<16x16xf32>
    %28 = arith.mulf %24, %27 : vector<16x16xf32>
    %29 = arith.addf %22, %28 : vector<16x16xf32>
    %30 = vector.extract_strided_slice %21 {offsets = [0, 0], sizes = [16, 32], strides = [1, 1]} : vector<16x128xf32> to vector<16x32xf32>
    %cst_18 = arith.constant 0.000000e+00 : f32
    %31 = vector.broadcast %cst_18 : f32 to vector<16x80xf32>
    %32 = tpu.concatenate %29, %30, %31 in 1 : vector<16x16xf32>, vector<16x32xf32>, vector<16x80xf32> -> vector<16x128xf32>
    %c0_19 = arith.constant 0 : index
    %c0_20 = arith.constant 0 : index
    %33 = vector.load %arg7[%c0_19, %c0_20] : memref<16x128xf32, #tpu.memory_space<vmem>>, vector<16x128xf32>
    tpu.vector_store %arg7[%c0_19, %c0_20], %32 {strides = array<i32>} : memref<16x128xf32, #tpu.memory_space<vmem>>, vector<16x128xf32>,
    return
  }
  func.func @transform_0(%arg0: i32) -> (i32, i32) {
    %c0_i32 = arith.constant 0 : i32
    %c0_i32_0 = arith.constant 0 : i32
    return %arg0, %c0_i32 : i32, i32
  }
  func.func @transform_1(%arg0: i32) -> (i32, i32) {
    %c0_i32 = arith.constant 0 : i32
    %c0_i32_0 = arith.constant 0 : i32
    %c0_i32_1 = arith.constant 0 : i32
    return %c0_i32, %c0_i32_0 : i32, i32
  }
  func.func @transform_2(%arg0: i32) -> (i32, i32) {
    %c0_i32 = arith.constant 0 : i32
    %c0_i32_0 = arith.constant 0 : i32
    %c0_i32_1 = arith.constant 0 : i32
    return %c0_i32, %c0_i32_0 : i32, i32
  }
  func.func @transform_3(%arg0: i32) -> (i32, i32) {
    %c0_i32 = arith.constant 0 : i32
    %c0_i32_0 = arith.constant 0 : i32
    %c0_i32_1 = arith.constant 0 : i32
    return %c0_i32, %c0_i32_0 : i32, i32
  }
  func.func @transform_4(%arg0: i32) -> (i32, i32) {
    %c0_i32 = arith.constant 0 : i32
    %c0_i32_0 = arith.constant 0 : i32
    %c0_i32_1 = arith.constant 0 : i32
    return %c0_i32, %c0_i32_0 : i32, i32
  }
  func.func @transform_5(%arg0: i32) -> (i32, i32) {
    %c0_i32 = arith.constant 0 : i32
    %c0_i32_0 = arith.constant 0 : i32
    return %arg0, %c0_i32 : i32, i32
  }
  func.func @transform_6(%arg0: i32) -> (i32, i32) {
    %c0_i32 = arith.constant 0 : i32
    %c0_i32_0 = arith.constant 0 : i32
    return %arg0, %c0_i32 : i32, i32
  }
}

module attributes {stable_mosaic.version = 11 : i64} {
  func.func @_vae_encoder_kernel(%arg0: i32, %arg1: memref<16x64xbf16, #tpu.memory_space<vmem>>, %arg2: memref<64x128xbf16, #tpu.memory_space<vmem>>, %arg3: memref<128x128xbf16, #tpu.memory_space<vmem>>, %arg4: memref<128x128xbf16, #tpu.memory_space<vmem>>, %arg5: memref<3x128xf32, #tpu.memory_space<vmem>>, %arg6: memref<16x16xf32, #tpu.memory_space<vmem>>, %arg7: memref<16x128xf32, #tpu.memory_space<vmem>>) attributes {dimension_semantics = [#tpu.dimension_semantics<parallel>], iteration_bounds = array<i64: 1>, scalar_prefetch = 0 : i64, scratch_operands = 0 : i64, tpu.core_type = #tpu.core_type<tc>, window_params = [{transform_indices = @transform_0, window_bounds = array<i64: 16, 64>}, {pipeline_mode = #tpu.pipeline_mode<synchronous>, transform_indices = @transform_1, window_bounds = array<i64: 64, 128>}, {pipeline_mode = #tpu.pipeline_mode<synchronous>, transform_indices = @transform_2, window_bounds = array<i64: 128, 128>}, {pipeline_mode = #tpu.pipeline_mode<synchronous>, transform_indices = @transform_3, window_bounds = array<i64: 128, 128>}, {pipeline_mode = #tpu.pipeline_mode<synchronous>, transform_indices = @transform_4, window_bounds = array<i64: 3, 128>}, {transform_indices = @transform_5, window_bounds = array<i64: 16, 16>}, {transform_indices = @transform_6, window_bounds = array<i64: 16, 128>}]} {
    %c0 = arith.constant 0 : index
    %c0_0 = arith.constant 0 : index
    %0 = vector.load %arg1[%c0, %c0_0] : memref<16x64xbf16, #tpu.memory_space<vmem>>, vector<16x64xbf16>
    %c0_1 = arith.constant 0 : index
    %c0_2 = arith.constant 0 : index
    %1 = vector.load %arg5[%c0_1, %c0_2] : memref<3x128xf32, #tpu.memory_space<vmem>>, vector<1x128xf32>
    %c0_3 = arith.constant 0 : index
    %c0_4 = arith.constant 0 : index
    %2 = vector.load %arg2[%c0_3, %c0_4] : memref<64x128xbf16, #tpu.memory_space<vmem>>, vector<64x128xbf16>
    %cst = arith.constant dense<0.000000e+00> : vector<16x128xf32>
    %3 = tpu.matmul %0, %2, %cst {dimension_numbers = #tpu.dot_dimension_numbers<[1], [0], [0], [1], [0, 0, 1, 1], [], []>} : vector<16x64xbf16>, vector<64x128xbf16>, vector<16x128xf32> -> vector<16x128xf32>
    %4 = vector.broadcast %1 : vector<1x128xf32> to vector<16x128xf32>
    %5 = arith.addf %3, %4 : vector<16x128xf32>
    %cst_5 = arith.constant 0.000000e+00 : f32
    %6 = vector.broadcast %cst_5 : f32 to vector<16x128xf32>
    %7 = arith.maximumf %5, %6 : vector<16x128xf32>
    %8 = arith.truncf %7 : vector<16x128xf32> to vector<16x128xbf16>
    %c1 = arith.constant 1 : index
    %c0_6 = arith.constant 0 : index
    %9 = vector.load %arg5[%c1, %c0_6] : memref<3x128xf32, #tpu.memory_space<vmem>>, vector<1x128xf32>
    %c0_7 = arith.constant 0 : index
    %c0_8 = arith.constant 0 : index
    %10 = vector.load %arg3[%c0_7, %c0_8] : memref<128x128xbf16, #tpu.memory_space<vmem>>, vector<128x128xbf16>
    %cst_9 = arith.constant dense<0.000000e+00> : vector<16x128xf32>
    %11 = tpu.matmul %8, %10, %cst_9 {dimension_numbers = #tpu.dot_dimension_numbers<[1], [0], [0], [1], [0, 0, 1, 1], [], []>} : vector<16x128xbf16>, vector<128x128xbf16>, vector<16x128xf32> -> vector<16x128xf32>
    %12 = vector.broadcast %9 : vector<1x128xf32> to vector<16x128xf32>
    %13 = arith.addf %11, %12 : vector<16x128xf32>
    %cst_10 = arith.constant 0.000000e+00 : f32
    %14 = vector.broadcast %cst_10 : f32 to vector<16x128xf32>
    %15 = arith.maximumf %13, %14 : vector<16x128xf32>
    %16 = arith.truncf %15 : vector<16x128xf32> to vector<16x128xbf16>
    %c2 = arith.constant 2 : index
    %c0_11 = arith.constant 0 : index
    %17 = vector.load %arg5[%c2, %c0_11] : memref<3x128xf32, #tpu.memory_space<vmem>>, vector<1x128xf32>
    %c0_12 = arith.constant 0 : index
    %c0_13 = arith.constant 0 : index
    %18 = vector.load %arg4[%c0_12, %c0_13] : memref<128x128xbf16, #tpu.memory_space<vmem>>, vector<128x128xbf16>
    %cst_14 = arith.constant dense<0.000000e+00> : vector<16x128xf32>
    %19 = tpu.matmul %16, %18, %cst_14 {dimension_numbers = #tpu.dot_dimension_numbers<[1], [0], [0], [1], [0, 0, 1, 1], [], []>} : vector<16x128xbf16>, vector<128x128xbf16>, vector<16x128xf32> -> vector<16x128xf32>
    %20 = vector.broadcast %17 : vector<1x128xf32> to vector<16x128xf32>
    %21 = arith.addf %19, %20 : vector<16x128xf32>
    %22 = vector.extract_strided_slice %21 {offsets = [0, 0], sizes = [16, 16], strides = [1, 1]} : vector<16x128xf32> to vector<16x16xf32>
    %23 = vector.extract_strided_slice %21 {offsets = [0, 16], sizes = [16, 16], strides = [1, 1]} : vector<16x128xf32> to vector<16x16xf32>
    %c0_15 = arith.constant 0 : index
    %c0_16 = arith.constant 0 : index
    %24 = vector.load %arg6[%c0_15, %c0_16] : memref<16x16xf32, #tpu.memory_space<vmem>>, vector<16x16xf32>
    %cst_17 = arith.constant 5.000000e-01 : f32
    %25 = vector.broadcast %cst_17 : f32 to vector<16x16xf32>
    %26 = arith.mulf %25, %23 : vector<16x16xf32>
    %27 = math.exp %26 : vector<16x16xf32>
    %28 = arith.mulf %24, %27 : vector<16x16xf32>
    %29 = arith.addf %22, %28 : vector<16x16xf32>
    %30 = vector.extract_strided_slice %21 {offsets = [0, 0], sizes = [16, 32], strides = [1, 1]} : vector<16x128xf32> to vector<16x32xf32>
    %cst_18 = arith.constant 0.000000e+00 : f32
    %31 = vector.broadcast %cst_18 : f32 to vector<16x80xf32>
    %32 = tpu.concatenate %29, %30, %31 in 1 : vector<16x16xf32>, vector<16x32xf32>, vector<16x80xf32> -> vector<16x128xf32>
    %c0_19 = arith.constant 0 : index
    %c0_20 = arith.constant 0 : index
    %33 = vector.load %arg7[%c0_19, %c0_20] : memref<16x128xf32, #tpu.memory_space<vmem>>, vector<16x128xf32>
    tpu.vector_store %arg7[%c0_19, %c0_20], %32 {strides = array<i32>} : memref<16x128xf32, #tpu.memory_space<vmem>>, vector<16x128xf32>,
    return
  }
  func.func @transform_0(%arg0: i32) -> (i32, i32) {
    %c0_i32 = arith.constant 0 : i32
    %c0_i32_0 = arith.constant 0 : i32
    return %arg0, %c0_i32 : i32, i32
  }
  func.func @transform_1(%arg0: i32) -> (i32, i32) {
    %c0_i32 = arith.constant 0 : i32
    %c0_i32_0 = arith.constant 0 : i32
    %c0_i32_1 = arith.constant 0 : i32
    return %c0_i32, %c0_i32_0 : i32, i32
  }
  func.func @transform_2(%arg0: i32) -> (i32, i32) {
    %c0_i32 = arith.constant 0 : i32
    %c0_i32_0 = arith.constant 0 : i32
    %c0_i32_1 = arith.constant 0 : i32
    return %c0_i32, %c0_i32_0 : i32, i32
  }
  func.func @transform_3(%arg0: i32) -> (i32, i32) {
    %c0_i32 = arith.constant 0 : i32
    %c0_i32_0 = arith.constant 0 : i32
    %c0_i32_1 = arith.constant 0 : i32
    return %c0_i32, %c0_i32_0 : i32, i32
  }
  func.func @transform_4(%arg0: i32) -> (i32, i32) {
    %c0_i32 = arith.constant 0 : i32
    %c0_i32_0 = arith.constant 0 : i32
    %c0_i32_1 = arith.constant 0 : i32
    return %c0_i32, %c0_i32_0 : i32, i32
  }
  func.func @transform_5(%arg0: i32) -> (i32, i32) {
    %c0_i32 = arith.constant 0 : i32
    %c0_i32_0 = arith.constant 0 : i32
    return %arg0, %c0_i32 : i32, i32
  }
  func.func @transform_6(%arg0: i32) -> (i32, i32) {
    %c0_i32 = arith.constant 0 : i32
    %c0_i32_0 = arith.constant 0 : i32
    return %arg0, %c0_i32 : i32, i32
  }
}

</mosaic_0001>

<bundles_post_ra>
// kernel: tpu_custom_call.1
= control target key start
LH: loop header
LB: loop body
LE: loop exit
PB: predicated region body
PF: predicated region fallthrough
CT: control target
= control target key end

     0   :  { %11 = vsyncpa [#allocation3], 0  ;;  %s779_s0 = inlined_call_operand.hbm [shape: bf16[16,64], index: 0, kind: input, shape index: {}]   ;;  %s780_s1 = inlined_call_operand.hbm [shape: bf16[64,128], index: 1, kind: input, shape index: {}]   ;;  %s781_s2 = inlined_call_operand.hbm [shape: bf16[128,128], index: 2, kind: input, shape index: {}]   ;;  %s782_s3 = inlined_call_operand.hbm [shape: bf16[128,128], index: 3, kind: input, shape index: {}]   ;;  %s783_s4 = inlined_call_operand.hbm [shape: f32[3,128], index: 4, kind: input, shape index: {}]   ;;  %s784_s5 = inlined_call_operand.hbm [shape: f32[16,16], index: 5, kind: input, shape index: {}]   ;;  %s785_s6 = inlined_call_operand.hbm [shape: f32[16,128], index: 6, kind: output, shape index: {}]  }
   0x1   :  { %12 = vsyncpa [#allocation6], 0 }
   0x2   :  { %13 = vsyncpa [#allocation9], 0 }
   0x3   :  { %14 = vsyncpa [#allocation12], 0 }
   0x4   :  { %15 = vsyncpa [#allocation4], 0  ;;  %s33_s23 = sshll.u32 %s780_s1, 4  ;;  %s704_s24 = smov [#allocation5]   ;;  %s34_s23 = int_to_ptr.hbm [resolvable:$true] %s33_s23 }
   0x5   :  { %s35_s25 = sshll.u32 %s704_s24, 4  ;;  %s59_s28 = sshll.u32 %s782_s3, 4  ;;  %s36_s25 = int_to_ptr.vmem [resolvable:$true] %s35_s25  ;;  %s60_s28 = int_to_ptr.hbm [resolvable:$true] %s59_s28 }
   0x6   :  { %s705_s29 = smov 64   ;;  %s706_s30 = smov 4  }
   0x7   :  { %41 = dma.hbm_to_vmem [thread:$0]  %s34_s23, 512, %s36_s25, [#allocation6], %s705_s29, %s705_s29, %s706_s30  }
   0x8   :  { %s707_s7 = smov [#allocation8]   ;;  %s20_s11 = sshll.u32 %s779_s0, 4  ;;  %s21_s11 = int_to_ptr.hbm [resolvable:$true] %s20_s11 }
   0x9   :  { %s61_s8 = sshll.u32 %s707_s7, 4  ;;  %s46_s13 = sshll.u32 %s781_s2, 4  ;;  %s62_s8 = int_to_ptr.vmem [resolvable:$true] %s61_s8  ;;  %s47_s13 = int_to_ptr.hbm [resolvable:$true] %s46_s13 }
   0xa   :  { %67 = dma.hbm_to_vmem [thread:$0]  %s60_s28, 1024, %s62_s8, [#allocation9], %s705_s29, %s705_s29, %s706_s30  }
   0xb   :  { %s708_s14 = smov [#allocation2]   ;;  %s709_s3 = smov [#allocation7]  }
   0xc   :  { %s22_s15 = sshll.u32 %s708_s14, 4  ;;  %s48_s16 = sshll.u32 %s709_s3, 4  ;;  %s23_s15 = int_to_ptr.vmem [resolvable:$true] %s22_s15  ;;  %s49_s16 = int_to_ptr.vmem [resolvable:$true] %s48_s16 }
   0xd   :  { %28 = dma.hbm_to_vmem [thread:$0]  %s21_s11, 128, %s23_s15, [#allocation3], %s705_s29, %s705_s29, %s706_s30  }
   0xe   :  { %s73_s19 = sshll.u32 %s783_s4, 4  ;;  %s83_s21 = sshll.u32 %s784_s5, 4  ;;  %s74_s19 = int_to_ptr.hbm [resolvable:$true] %s73_s19  ;;  %s84_s21 = int_to_ptr.hbm [resolvable:$true] %s83_s21 }
   0xf   :  { %54 = dma.hbm_to_vmem [thread:$0]  %s47_s13, 1024, %s49_s16, [#allocation6], %s705_s29, %s705_s29, %s706_s30  }
  0x10   :  { %s710_s22 = smov [#allocation10]   ;;  %s711_s23 = smov [#allocation11]  }
  0x11   :  { %s75_s2 = sshll.u32 %s710_s22, 4  ;;  %s85_s24 = sshll.u32 %s711_s23, 4  ;;  %s76_s2 = int_to_ptr.vmem [resolvable:$true] %s75_s2  ;;  %s86_s24 = int_to_ptr.vmem [resolvable:$true] %s85_s24 }
  0x12   :  { %78 = dma.hbm_to_vmem [thread:$0]  %s74_s19, 64, %s76_s2, [#allocation9]  }
  0x13   :  { %s712_s25 = smov 128   ;;  %s713_s26 = smov 8  }
  0x14   :  { %91 = dma.hbm_to_vmem [thread:$0]  %s84_s21, 256, %s86_s24, [#allocation12], %s712_s25, %s712_s25, %s713_s26  }
  0x15   :  { %694 = dma.done.wait [#allocation3], 128  }
  0x16   :  { %695 = vsyncadd [#allocation3], 4294967168 }
  0x17   :  { %696 = dma.done.wait [#allocation6], 1536  }
  0x18   :  { %697 = vsyncadd [#allocation6], 4294965760 }
  0x19   :  { %698 = dma.done.wait [#allocation9], 1088  }
  0x1a   :  { %699 = vsyncadd [#allocation9], 4294966208 }
  0x1b   :  { %700 = dma.done.wait [#allocation12], 256  }
  0x1c   :  { %701 = vsyncadd [#allocation12], 4294967040  ;;  %v489_v0 = vld [vmem:[#allocation5 + $0x18] sm:$0xff]  ;;  %v488_v2 = vld [vmem:[#allocation5 + $0x10] sm:$0xff]  ;;  %vm158_vm0 = vcmask 523264   ;;  %s714_s4 = smov 16  }
  0x1d   :  { %v497_v1 = vld [vmem:[#allocation7 + $0x38] sm:$0xff]  ;;  %166 = vmatpush.bf16.msra.mxu0 %v489_v0  ;;  %v496_v3 = vld [vmem:[#allocation7 + $0x30] sm:$0xff]  ;;  %v487_v4 = vld [vmem:[#allocation5 + $0x8] sm:$0xff]  ;;  %s715_s5 = smov 112   ;;  %vm370_vm1 = vcmask 130048   ;;  %vm373_vm2 = vcmask 392192  }
  0x1e   :  { %245 = vmatpush.bf16.msra.mxu1 %v497_v1  ;;  %v495_v5 = vld [vmem:[#allocation7 + $0x28] sm:$0xff]  ;;  %v486_v6 = vld [vmem:[#allocation5] sm:$0xff]  ;;  %v485_v8 = vld [vmem:[#allocation2] sm:$0xff]  ;;  %s716_s27 = smov [#allocation13]   ;;  %s384_s7 = sshll.u32 %s785_s6, 4  ;;  %s385_s7 = int_to_ptr.hbm [resolvable:$true] %s384_s7 }
  0x1f   :  { %v494_v7 = vld [vmem:[#allocation7 + $0x20] sm:$0xff]  ;;  %v493_v9 = vld [vmem:[#allocation7 + $0x18] sm:$0xff]  ;;  %v492_v10 = vld [vmem:[#allocation7 + $0x10] sm:$0xff]  ;;  %s382_s28 = sshll.u32 %s716_s27, 4  ;;  %s383_s28 = int_to_ptr.vmem [resolvable:$true] %s382_s28 }
  0x20   :  { %v491_v11 = vld [vmem:[#allocation7 + $0x8] sm:$0xff]  ;;  %v490_v12 = vld [vmem:[#allocation7] sm:$0xff]  ;;  %v505_v13 = vld [vmem:[#allocation8 + $0x38] sm:$0xff] }
  0x21   :  { %167 = vmatpush.bf16.msra.mxu0 %v488_v2  ;;  %328 = vmatpush.bf16.msra.mxu2 %v505_v13  ;;  %v504_v14 = vld [vmem:[#allocation8 + $0x30] sm:$0xff]  ;;  %v503_v15 = vld [vmem:[#allocation8 + $0x28] sm:$0xff]  ;;  %v502_v16 = vld [vmem:[#allocation8 + $0x20] sm:$0xff] }
  0x22   :  { %246 = vmatpush.bf16.msra.mxu1 %v496_v3  ;;  %v519_v18 = vld [vmem:[#allocation10] ss:$0 sm:$0xff]  ;;  %v501_v25 = vld [vmem:[#allocation8 + $0x18] sm:$0xff]  ;;  %v500_v26 = vld [vmem:[#allocation8 + $0x10] sm:$0xff] }
  0x23   :  { %v499_v27 = vld [vmem:[#allocation8 + $0x8] sm:$0xff]  ;;  %v498_v28 = vld [vmem:[#allocation8] sm:$0xff] }
  0x24   :  { %v520_v30 = vld [vmem:[#allocation10 + $0x1] ss:$0 sm:$0xff]  ;;  %v521_v37 = vld [vmem:[#allocation10 + $0x2] ss:$0 sm:$0xff]  ;;  %v342_v48 = vld [vmem:[#allocation11] sm:$0xff] }
  0x25   :  { %168 = vmatpush.bf16.msra.mxu0 %v487_v4  ;;  %329 = vmatpush.bf16.msra.mxu2 %v504_v14  ;;  %v343_v54 = vld [vmem:[#allocation11 + $0x8] sm:$0xff] }
  0x26   :  { %247 = vmatpush.bf16.msra.mxu1 %v495_v5 }
  0x29   :  { %169 = vmatpush.bf16.msra.mxu0 %v486_v6  ;;  %330 = vmatpush.bf16.msra.mxu2 %v503_v15 }
  0x2a   :  { %248 = vmatpush.bf16.msra.mxu1 %v494_v7 }
  0x2c   :  { %420 = vmatmul.msk.bf16.vlgmr.msra.gmra.mxu0 %vm158_vm0, %v485_v8 }
  0x2d   :  { %331 = vmatpush.bf16.msra.mxu2 %v502_v16 }
  0x2e   :  { %249 = vmatpush.bf16.msra.mxu1 %v493_v9 }
  0x31   :  { %332 = vmatpush.bf16.msra.mxu2 %v501_v25 }
  0x32   :  { %250 = vmatpush.bf16.msra.mxu1 %v492_v10 }
  0x35   :  { %333 = vmatpush.bf16.msra.mxu2 %v500_v26 }
  0x36   :  { %251 = vmatpush.bf16.msra.mxu1 %v491_v11 }
  0x39   :  { %334 = vmatpush.bf16.msra.mxu2 %v499_v27 }
  0x3a   :  { %252 = vmatpush.bf16.msra.mxu1 %v490_v12 }
  0x3d   :  { %335 = vmatpush.bf16.msra.mxu2 %v498_v28 }
  0xa9   :  { %v171_v17 = vpop.f32.mrf.mxu0 }
  0xaa   :  { %v172_v19 = vadd.f32 %v519_v18, %v171_v17 }
  0xac   :  { %v176_v22 = vmax.f32 %v172_v19, 0.0 }
  0xb1   :  { %v173_v20 = vpop.f32.mrf.mxu0 }
  0xb2   :  { %v174_v21 = vadd.f32 %v519_v18, %v173_v20 }
  0xb4   :  { %v177_v23 = vmax.f32 %v174_v21, 0.0 }
  0xb6   :  { %v178_v24 = vpack.c.bf16 %v177_v23, %v176_v22 }
  0xb8   :  { %253 = vmatmul.bf16.vlgmr.msra.gmra.mxu1 %v178_v24 }
 0x135   :  { %v254_v29 = vpop.f32.mrf.mxu1 }
 0x136   :  { %v255_v31 = vadd.f32 %v520_v30, %v254_v29 }
 0x138   :  { %v259_v34 = vmax.f32 %v255_v31, 0.0 }
 0x13d   :  { %v256_v32 = vpop.f32.mrf.mxu1 }
 0x13e   :  { %v257_v33 = vadd.f32 %v520_v30, %v256_v32 }
 0x140   :  { %v260_v35 = vmax.f32 %v257_v33, 0.0 }
 0x142   :  { %v261_v36 = vpack.c.bf16 %v260_v35, %v259_v34 }
 0x144   :  { %336 = vmatmul.bf16.vlgmr.msra.gmra.mxu2 %v261_v36 }
 0x1c7   :  { %v337_v38 = vpop.f32.mrf.mxu2 }
 0x1c8   :  { %v338_v39 = vadd.f32 %v521_v37, %v337_v38 }
 0x1ca   :  { %v344_v40 = vmul.f32 0.5, %v338_v39  ;;  %364 = vrot.lane.b32.xlu1 %v338_v39, %s714_s4 }
 0x1cc   :  { %v346_v41 = vmul.f32 1.442695, %v344_v40 }
 0x1ce   :  { %522 = vpow2.f32 %v346_v41 }
 0x1cf   :  { %v339_v42 = vpop.f32.mrf.mxu2 }
 0x1d0   :  { %v340_v43 = vadd.f32 %v521_v37, %v339_v42 }
 0x1d2   :  { %v345_v44 = vmul.f32 0.5, %v340_v43  ;;  %366 = vrot.lane.b32.xlu1 %v340_v43, %s714_s4 }
 0x1d4   :  { %v523_v45 = vpop.eup %522  ;;  %v348_v46 = vmul.f32 1.442695, %v345_v44 }
 0x1d5   :  { %352 = vrot.lane.b32.xlu0 %v523_v45, %s715_s5 }
 0x1d6   :  { %524 = vpow2.f32 %v348_v46 }
 0x1dc   :  { %v525_v47 = vpop.eup %524 }
 0x1dd   :  { %354 = vrot.lane.b32.xlu0 %v525_v47, %s715_s5 }
 0x23c   :  { %v365_v51 = vpop.permute.xlu1 %364 }
 0x244   :  { %v367_v59 = vpop.permute.xlu1 %366 }
 0x247   :  { %v353_v49 = vpop.permute.xlu0 %352 }
 0x248   :  { %v358_v50 = vmul.f32 %v353_v49, %v342_v48 }
 0x24a   :  { %v360_v52 = vadd.f32 %v358_v50, %v338_v39 }
 0x24c   :  { %v371_v53 = vsel %vm370_vm1, %v360_v52, %v365_v51 }
 0x24d   :  { %v374_v55 = vsel %vm373_vm2, %v371_v53, 0.0 }
 0x24e   :  { %376 = vst [vmem:[#allocation13] sm:$0xff] %v374_v55 }
 0x24f   :  { %v355_v56 = vpop.permute.xlu0 %354 }
 0x250   :  { %v359_v57 = vmul.f32 %v355_v56, %v343_v54 }
 0x252   :  { %v361_v58 = vadd.f32 %v359_v57, %v340_v43 }
 0x254   :  { %v372_v60 = vsel %vm370_vm1, %v361_v58, %v367_v59 }
 0x255   :  { %v375_v61 = vsel %vm373_vm2, %v372_v60, 0.0 }
 0x256   :  { %377 = vst [vmem:[#allocation13 + $0x8] sm:$0xff] %v375_v61 }
 0x257   :  { %390 = dma.vmem_to_hbm [thread:$0]  %s383_s28, 256, %s385_s7, [#allocation4], %s712_s25, %s712_s25, %s713_s26  }
 0x258   :  { %702 = dma.done.wait [#allocation4], 256  }
 0x259   :  { %703 = vsyncadd [#allocation4], 4294967040 }
 0x25a   :  { %395 = vsyncpa [#allocation3], 1 }
 0x25b   :  { %396 = vsyncpa [#allocation6], 1 }
 0x25c   :  { %397 = vsyncpa [#allocation9], 1 }
 0x25d   :  { %398 = vsyncpa [#allocation12], 1 }
 0x25e   :  { %399 = vsyncpa [#allocation4], 1 }

// kernel: tpu_custom_call.1
= control target key start
LH: loop header
LB: loop body
LE: loop exit
PB: predicated region body
PF: predicated region fallthrough
CT: control target
= control target key end

     0   :  { %11 = vsyncpa [#allocation3], 0  ;;  %s779_s0 = inlined_call_operand.hbm [shape: bf16[16,64], index: 0, kind: input, shape index: {}]   ;;  %s780_s1 = inlined_call_operand.hbm [shape: bf16[64,128], index: 1, kind: input, shape index: {}]   ;;  %s781_s2 = inlined_call_operand.hbm [shape: bf16[128,128], index: 2, kind: input, shape index: {}]   ;;  %s782_s3 = inlined_call_operand.hbm [shape: bf16[128,128], index: 3, kind: input, shape index: {}]   ;;  %s783_s4 = inlined_call_operand.hbm [shape: f32[3,128], index: 4, kind: input, shape index: {}]   ;;  %s784_s5 = inlined_call_operand.hbm [shape: f32[16,16], index: 5, kind: input, shape index: {}]   ;;  %s785_s6 = inlined_call_operand.hbm [shape: f32[16,128], index: 6, kind: output, shape index: {}]  }
   0x1   :  { %12 = vsyncpa [#allocation6], 0 }
   0x2   :  { %13 = vsyncpa [#allocation9], 0 }
   0x3   :  { %14 = vsyncpa [#allocation12], 0 }
   0x4   :  { %15 = vsyncpa [#allocation4], 0  ;;  %s33_s23 = sshll.u32 %s780_s1, 4  ;;  %s704_s24 = smov [#allocation5]   ;;  %s34_s23 = int_to_ptr.hbm [resolvable:$true] %s33_s23 }
   0x5   :  { %s35_s25 = sshll.u32 %s704_s24, 4  ;;  %s59_s28 = sshll.u32 %s782_s3, 4  ;;  %s36_s25 = int_to_ptr.vmem [resolvable:$true] %s35_s25  ;;  %s60_s28 = int_to_ptr.hbm [resolvable:$true] %s59_s28 }
   0x6   :  { %s705_s29 = smov 64   ;;  %s706_s30 = smov 4  }
   0x7   :  { %41 = dma.hbm_to_vmem [thread:$0]  %s34_s23, 512, %s36_s25, [#allocation6], %s705_s29, %s705_s29, %s706_s30  }
   0x8   :  { %s707_s7 = smov [#allocation8]   ;;  %s20_s11 = sshll.u32 %s779_s0, 4  ;;  %s21_s11 = int_to_ptr.hbm [resolvable:$true] %s20_s11 }
   0x9   :  { %s61_s8 = sshll.u32 %s707_s7, 4  ;;  %s46_s13 = sshll.u32 %s781_s2, 4  ;;  %s62_s8 = int_to_ptr.vmem [resolvable:$true] %s61_s8  ;;  %s47_s13 = int_to_ptr.hbm [resolvable:$true] %s46_s13 }
   0xa   :  { %67 = dma.hbm_to_vmem [thread:$0]  %s60_s28, 1024, %s62_s8, [#allocation9], %s705_s29, %s705_s29, %s706_s30  }
   0xb   :  { %s708_s14 = smov [#allocation2]   ;;  %s709_s3 = smov [#allocation7]  }
   0xc   :  { %s22_s15 = sshll.u32 %s708_s14, 4  ;;  %s48_s16 = sshll.u32 %s709_s3, 4  ;;  %s23_s15 = int_to_ptr.vmem [resolvable:$true] %s22_s15  ;;  %s49_s16 = int_to_ptr.vmem [resolvable:$true] %s48_s16 }
   0xd   :  { %28 = dma.hbm_to_vmem [thread:$0]  %s21_s11, 128, %s23_s15, [#allocation3], %s705_s29, %s705_s29, %s706_s30  }
   0xe   :  { %s73_s19 = sshll.u32 %s783_s4, 4  ;;  %s83_s21 = sshll.u32 %s784_s5, 4  ;;  %s74_s19 = int_to_ptr.hbm [resolvable:$true] %s73_s19  ;;  %s84_s21 = int_to_ptr.hbm [resolvable:$true] %s83_s21 }
   0xf   :  { %54 = dma.hbm_to_vmem [thread:$0]  %s47_s13, 1024, %s49_s16, [#allocation6], %s705_s29, %s705_s29, %s706_s30  }
  0x10   :  { %s710_s22 = smov [#allocation10]   ;;  %s711_s23 = smov [#allocation11]  }
  0x11   :  { %s75_s2 = sshll.u32 %s710_s22, 4  ;;  %s85_s24 = sshll.u32 %s711_s23, 4  ;;  %s76_s2 = int_to_ptr.vmem [resolvable:$true] %s75_s2  ;;  %s86_s24 = int_to_ptr.vmem [resolvable:$true] %s85_s24 }
  0x12   :  { %78 = dma.hbm_to_vmem [thread:$0]  %s74_s19, 64, %s76_s2, [#allocation9]  }
  0x13   :  { %s712_s25 = smov 128   ;;  %s713_s26 = smov 8  }
  0x14   :  { %91 = dma.hbm_to_vmem [thread:$0]  %s84_s21, 256, %s86_s24, [#allocation12], %s712_s25, %s712_s25, %s713_s26  }
  0x15   :  { %694 = dma.done.wait [#allocation3], 128  }
  0x16   :  { %695 = vsyncadd [#allocation3], 4294967168 }
  0x17   :  { %696 = dma.done.wait [#allocation6], 1536  }
  0x18   :  { %697 = vsyncadd [#allocation6], 4294965760 }
  0x19   :  { %698 = dma.done.wait [#allocation9], 1088  }
  0x1a   :  { %699 = vsyncadd [#allocation9], 4294966208 }
  0x1b   :  { %700 = dma.done.wait [#allocation12], 256  }
  0x1c   :  { %701 = vsyncadd [#allocation12], 4294967040  ;;  %v489_v0 = vld [vmem:[#allocation5 + $0x18] sm:$0xff]  ;;  %v488_v2 = vld [vmem:[#allocation5 + $0x10] sm:$0xff]  ;;  %vm158_vm0 = vcmask 523264   ;;  %s714_s4 = smov 16  }
  0x1d   :  { %v497_v1 = vld [vmem:[#allocation7 + $0x38] sm:$0xff]  ;;  %166 = vmatpush.bf16.msra.mxu0 %v489_v0  ;;  %v496_v3 = vld [vmem:[#allocation7 + $0x30] sm:$0xff]  ;;  %v487_v4 = vld [vmem:[#allocation5 + $0x8] sm:$0xff]  ;;  %s715_s5 = smov 112   ;;  %vm370_vm1 = vcmask 130048   ;;  %vm373_vm2 = vcmask 392192  }
  0x1e   :  { %245 = vmatpush.bf16.msra.mxu1 %v497_v1  ;;  %v495_v5 = vld [vmem:[#allocation7 + $0x28] sm:$0xff]  ;;  %v486_v6 = vld [vmem:[#allocation5] sm:$0xff]  ;;  %v485_v8 = vld [vmem:[#allocation2] sm:$0xff]  ;;  %s716_s27 = smov [#allocation13]   ;;  %s384_s7 = sshll.u32 %s785_s6, 4  ;;  %s385_s7 = int_to_ptr.hbm [resolvable:$true] %s384_s7 }
  0x1f   :  { %v494_v7 = vld [vmem:[#allocation7 + $0x20] sm:$0xff]  ;;  %v493_v9 = vld [vmem:[#allocation7 + $0x18] sm:$0xff]  ;;  %v492_v10 = vld [vmem:[#allocation7 + $0x10] sm:$0xff]  ;;  %s382_s28 = sshll.u32 %s716_s27, 4  ;;  %s383_s28 = int_to_ptr.vmem [resolvable:$true] %s382_s28 }
  0x20   :  { %v491_v11 = vld [vmem:[#allocation7 + $0x8] sm:$0xff]  ;;  %v490_v12 = vld [vmem:[#allocation7] sm:$0xff]  ;;  %v505_v13 = vld [vmem:[#allocation8 + $0x38] sm:$0xff] }
  0x21   :  { %167 = vmatpush.bf16.msra.mxu0 %v488_v2  ;;  %328 = vmatpush.bf16.msra.mxu2 %v505_v13  ;;  %v504_v14 = vld [vmem:[#allocation8 + $0x30] sm:$0xff]  ;;  %v503_v15 = vld [vmem:[#allocation8 + $0x28] sm:$0xff]  ;;  %v502_v16 = vld [vmem:[#allocation8 + $0x20] sm:$0xff] }
  0x22   :  { %246 = vmatpush.bf16.msra.mxu1 %v496_v3  ;;  %v519_v18 = vld [vmem:[#allocation10] ss:$0 sm:$0xff]  ;;  %v501_v25 = vld [vmem:[#allocation8 + $0x18] sm:$0xff]  ;;  %v500_v26 = vld [vmem:[#allocation8 + $0x10] sm:$0xff] }
  0x23   :  { %v499_v27 = vld [vmem:[#allocation8 + $0x8] sm:$0xff]  ;;  %v498_v28 = vld [vmem:[#allocation8] sm:$0xff] }
  0x24   :  { %v520_v30 = vld [vmem:[#allocation10 + $0x1] ss:$0 sm:$0xff]  ;;  %v521_v37 = vld [vmem:[#allocation10 + $0x2] ss:$0 sm:$0xff]  ;;  %v342_v48 = vld [vmem:[#allocation11] sm:$0xff] }
  0x25   :  { %168 = vmatpush.bf16.msra.mxu0 %v487_v4  ;;  %329 = vmatpush.bf16.msra.mxu2 %v504_v14  ;;  %v343_v54 = vld [vmem:[#allocation11 + $0x8] sm:$0xff] }
  0x26   :  { %247 = vmatpush.bf16.msra.mxu1 %v495_v5 }
  0x29   :  { %169 = vmatpush.bf16.msra.mxu0 %v486_v6  ;;  %330 = vmatpush.bf16.msra.mxu2 %v503_v15 }
  0x2a   :  { %248 = vmatpush.bf16.msra.mxu1 %v494_v7 }
  0x2c   :  { %420 = vmatmul.msk.bf16.vlgmr.msra.gmra.mxu0 %vm158_vm0, %v485_v8 }
  0x2d   :  { %331 = vmatpush.bf16.msra.mxu2 %v502_v16 }
  0x2e   :  { %249 = vmatpush.bf16.msra.mxu1 %v493_v9 }
  0x31   :  { %332 = vmatpush.bf16.msra.mxu2 %v501_v25 }
  0x32   :  { %250 = vmatpush.bf16.msra.mxu1 %v492_v10 }
  0x35   :  { %333 = vmatpush.bf16.msra.mxu2 %v500_v26 }
  0x36   :  { %251 = vmatpush.bf16.msra.mxu1 %v491_v11 }
  0x39   :  { %334 = vmatpush.bf16.msra.mxu2 %v499_v27 }
  0x3a   :  { %252 = vmatpush.bf16.msra.mxu1 %v490_v12 }
  0x3d   :  { %335 = vmatpush.bf16.msra.mxu2 %v498_v28 }
  0xa9   :  { %v171_v17 = vpop.f32.mrf.mxu0 }
  0xaa   :  { %v172_v19 = vadd.f32 %v519_v18, %v171_v17 }
  0xac   :  { %v176_v22 = vmax.f32 %v172_v19, 0.0 }
  0xb1   :  { %v173_v20 = vpop.f32.mrf.mxu0 }
  0xb2   :  { %v174_v21 = vadd.f32 %v519_v18, %v173_v20 }
  0xb4   :  { %v177_v23 = vmax.f32 %v174_v21, 0.0 }
  0xb6   :  { %v178_v24 = vpack.c.bf16 %v177_v23, %v176_v22 }
  0xb8   :  { %253 = vmatmul.bf16.vlgmr.msra.gmra.mxu1 %v178_v24 }
 0x135   :  { %v254_v29 = vpop.f32.mrf.mxu1 }
 0x136   :  { %v255_v31 = vadd.f32 %v520_v30, %v254_v29 }
 0x138   :  { %v259_v34 = vmax.f32 %v255_v31, 0.0 }
 0x13d   :  { %v256_v32 = vpop.f32.mrf.mxu1 }
 0x13e   :  { %v257_v33 = vadd.f32 %v520_v30, %v256_v32 }
 0x140   :  { %v260_v35 = vmax.f32 %v257_v33, 0.0 }
 0x142   :  { %v261_v36 = vpack.c.bf16 %v260_v35, %v259_v34 }
 0x144   :  { %336 = vmatmul.bf16.vlgmr.msra.gmra.mxu2 %v261_v36 }
 0x1c7   :  { %v337_v38 = vpop.f32.mrf.mxu2 }
 0x1c8   :  { %v338_v39 = vadd.f32 %v521_v37, %v337_v38 }
 0x1ca   :  { %v344_v40 = vmul.f32 0.5, %v338_v39  ;;  %364 = vrot.lane.b32.xlu1 %v338_v39, %s714_s4 }
 0x1cc   :  { %v346_v41 = vmul.f32 1.442695, %v344_v40 }
 0x1ce   :  { %522 = vpow2.f32 %v346_v41 }
 0x1cf   :  { %v339_v42 = vpop.f32.mrf.mxu2 }
 0x1d0   :  { %v340_v43 = vadd.f32 %v521_v37, %v339_v42 }
 0x1d2   :  { %v345_v44 = vmul.f32 0.5, %v340_v43  ;;  %366 = vrot.lane.b32.xlu1 %v340_v43, %s714_s4 }
 0x1d4   :  { %v523_v45 = vpop.eup %522  ;;  %v348_v46 = vmul.f32 1.442695, %v345_v44 }
 0x1d5   :  { %352 = vrot.lane.b32.xlu0 %v523_v45, %s715_s5 }
 0x1d6   :  { %524 = vpow2.f32 %v348_v46 }
 0x1dc   :  { %v525_v47 = vpop.eup %524 }
 0x1dd   :  { %354 = vrot.lane.b32.xlu0 %v525_v47, %s715_s5 }
 0x23c   :  { %v365_v51 = vpop.permute.xlu1 %364 }
 0x244   :  { %v367_v59 = vpop.permute.xlu1 %366 }
 0x247   :  { %v353_v49 = vpop.permute.xlu0 %352 }
 0x248   :  { %v358_v50 = vmul.f32 %v353_v49, %v342_v48 }
 0x24a   :  { %v360_v52 = vadd.f32 %v358_v50, %v338_v39 }
 0x24c   :  { %v371_v53 = vsel %vm370_vm1, %v360_v52, %v365_v51 }
 0x24d   :  { %v374_v55 = vsel %vm373_vm2, %v371_v53, 0.0 }
 0x24e   :  { %376 = vst [vmem:[#allocation13] sm:$0xff] %v374_v55 }
 0x24f   :  { %v355_v56 = vpop.permute.xlu0 %354 }
 0x250   :  { %v359_v57 = vmul.f32 %v355_v56, %v343_v54 }
 0x252   :  { %v361_v58 = vadd.f32 %v359_v57, %v340_v43 }
 0x254   :  { %v372_v60 = vsel %vm370_vm1, %v361_v58, %v367_v59 }
 0x255   :  { %v375_v61 = vsel %vm373_vm2, %v372_v60, 0.0 }
 0x256   :  { %377 = vst [vmem:[#allocation13 + $0x8] sm:$0xff] %v375_v61 }
 0x257   :  { %390 = dma.vmem_to_hbm [thread:$0]  %s383_s28, 256, %s385_s7, [#allocation4], %s712_s25, %s712_s25, %s713_s26  }
 0x258   :  { %702 = dma.done.wait [#allocation4], 256  }
 0x259   :  { %703 = vsyncadd [#allocation4], 4294967040 }
 0x25a   :  { %395 = vsyncpa [#allocation3], 1 }
 0x25b   :  { %396 = vsyncpa [#allocation6], 1 }
 0x25c   :  { %397 = vsyncpa [#allocation9], 1 }
 0x25d   :  { %398 = vsyncpa [#allocation12], 1 }
 0x25e   :  { %399 = vsyncpa [#allocation4], 1 }

</bundles_post_ra>
